<compile_context>
chip_gen: v5e
topology: v5e:2x2
jax: 0.10.0
libtpu: 0.0.40
codegen_flags: <defaults>
</compile_context>

<pallas_src>
import functools

import numpy as np
import jax
import jax.numpy as jnp
from jax import lax
from jax.experimental import pallas as pl
from jax.experimental.pallas import tpu as pltpu


def fire_kernel(x_ref, wsq_ref, bsq_ref, we1_ref, be1_ref, we3_ref, be3_ref,
                mask_ref, out_ref, *, W):
    """One grid step processes B images laid side by side on the lane axis.

    x_ref   : (Cin, L)        f32   L = B * Lp (Lp = per-image lane-padded H*W)
    wsq_ref : (Csq, Cin)      bf16  bsq_ref : (Csq, 1) f32
    we1_ref : (Ce1, Csq)      bf16  be1_ref : (Ce1, 1) f32
    we3_ref : (9, Ce3, Csq)   bf16  be3_ref : (Ce3, 1) f32   (tap-major 3x3)
    mask_ref: (9, L)          f32   per-tap border / pad / wrap masks
    out_ref : (Ce1 + Ce3, L)  f32
    """
    L = x_ref.shape[1]
    Ce1 = we1_ref.shape[0]
    Ce3 = we3_ref.shape[1]

    # --- squeeze 1x1 + ReLU: one wide MXU matmul (bf16 operands, f32 acc) ---
    x = x_ref[...].astype(jnp.bfloat16)
    s = jnp.dot(wsq_ref[...], x, preferred_element_type=jnp.float32)
    s = jnp.maximum(s + bsq_ref[...], 0.0)                 # (Csq, L) f32
    s_bf = s.astype(jnp.bfloat16)

    # --- expand 1x1 + ReLU, written straight into output channels [0, Ce1) ---
    e1 = jnp.dot(we1_ref[...], s_bf, preferred_element_type=jnp.float32)
    out_ref[:Ce1, :] = jnp.maximum(e1 + be1_ref[...], 0.0).astype(out_ref.dtype)

    # --- expand 3x3 (padding=1) + ReLU: 9 accumulating K=Csq matmuls on
    #     lane-rotated copies of s.  Any rotation wrap (image border, image-to-
    #     image, pad columns) lands exactly where the precomputed tap mask is 0.
    acc = jnp.zeros((Ce3, L), jnp.float32)
    for dy in range(3):
        for dx in range(3):
            k = dy * 3 + dx
            if k == 4:                         # centre tap: no shift, no mask
                t_bf = s_bf
            else:
                off = (dy - 1) * W + (dx - 1)  # source pixel offset for this tap
                t = pltpu.roll(s, shift=(-off) % L, axis=1)   # f32 XLU rotate
                t = t * mask_ref[k:k + 1, :]                  # zero invalid taps
                t_bf = t.astype(jnp.bfloat16)
            acc = acc + jnp.dot(we3_ref[k], t_bf,
                                preferred_element_type=jnp.float32)
    out_ref[Ce1:, :] = jnp.maximum(acc + be3_ref[...], 0.0).astype(out_ref.dtype)


def _pick_images_per_step(N, Lp, target_lanes=2048):
    """Largest divisor B of N with B*Lp <= target_lanes and grid N//B >= 2
    (keeps both v7x TensorCores busy); falls back to 1."""
    best = 1
    for d in range(2, N + 1):
        if N % d == 0 and d * Lp <= target_lanes and N // d >= 2:
            best = d
    return best


def _build_tap_masks(H, W, Lp, B):
    """(9, B*Lp) f32 masks: 1 where tap (dy,dx) reads a real in-image pixel."""
    HW = H * W
    q = np.arange(Lp)
    h = q // W
    w = q % W
    valid = q < HW
    masks = np.zeros((9, Lp), np.float32)
    for dy in range(3):
        row_ok = np.ones(Lp, bool)
        if dy == 0:
            row_ok = h >= 1
        elif dy == 2:
            row_ok = h <= H - 2
        for dx in range(3):
            col_ok = np.ones(Lp, bool)
            if dx == 0:
                col_ok = w >= 1
            elif dx == 2:
                col_ok = w <= W - 2
            masks[dy * 3 + dx] = (row_ok & col_ok & valid).astype(np.float32)
    return jnp.asarray(np.tile(masks, (1, B)), dtype=jnp.float32)


def fire_pallas(x_nchw, w_sq, b_sq, w_e1, b_e1, w_e3, b_e3):
    """Fire forward.  Weights in PyTorch Conv2d layout:
       w_sq (Csq,Cin,1,1), w_e1 (Ce1,Csq,1,1), w_e3 (Ce3,Csq,3,3); biases 1-D."""
    N, Cin, H, W = x_nchw.shape
    Csq = w_sq.shape[0]
    Ce1 = w_e1.shape[0]
    Ce3 = w_e3.shape[0]
    Cout = Ce1 + Ce3
    HW = H * W
    Lp = ((HW + 127) // 128) * 128            # per-image lane-padded extent
    B = _pick_images_per_step(N, Lp)          # images per grid step
    L = B * Lp                                # lane width of every matmul

    # Kernel-layout weights (out-channels on sublanes), bf16 matmul operands.
    wsq_k = w_sq.reshape(Csq, Cin).astype(jnp.bfloat16)
    we1_k = w_e1.reshape(Ce1, Csq).astype(jnp.bfloat16)
    we3_k = jnp.transpose(w_e3, (2, 3, 0, 1)).reshape(9, Ce3, Csq).astype(jnp.bfloat16)
    bsq_k = b_sq.reshape(Csq, 1).astype(jnp.float32)
    be1_k = b_e1.reshape(Ce1, 1).astype(jnp.float32)
    be3_k = b_e3.reshape(Ce3, 1).astype(jnp.float32)
    masks = _build_tap_masks(H, W, Lp, B)

    # Layout plumbing (wrapper-side): channels -> sublanes, (image,pixel) -> lanes.
    x2 = jnp.transpose(x_nchw, (1, 0, 2, 3)).reshape(Cin, N, HW)
    if Lp != HW:
        x2 = jnp.pad(x2, ((0, 0), (0, 0), (0, Lp - HW)))
    x2 = x2.reshape(Cin, N * Lp)

    kernel = functools.partial(fire_kernel, W=W)
    out = pl.pallas_call(
        kernel,
        out_shape=jax.ShapeDtypeStruct((Cout, N * Lp), jnp.float32),
        grid=(N // B,),
        in_specs=[
            pl.BlockSpec((Cin, L), lambda n: (0, n)),
            pl.BlockSpec((Csq, Cin), lambda n: (0, 0)),
            pl.BlockSpec((Csq, 1), lambda n: (0, 0)),
            pl.BlockSpec((Ce1, Csq), lambda n: (0, 0)),
            pl.BlockSpec((Ce1, 1), lambda n: (0, 0)),
            pl.BlockSpec((9, Ce3, Csq), lambda n: (0, 0, 0)),
            pl.BlockSpec((Ce3, 1), lambda n: (0, 0)),
            pl.BlockSpec((9, L), lambda n: (0, 0)),
        ],
        out_specs=pl.BlockSpec((Cout, L), lambda n: (0, n)),
        compiler_params=pltpu.CompilerParams(
            dimension_semantics=("parallel",)),
    )(x2, wsq_k, bsq_k, we1_k, be1_k, we3_k, be3_k, masks)

    out = out.reshape(Cout, N, Lp)[:, :, :HW].reshape(Cout, N, H, W)
    return jnp.transpose(out, (1, 0, 2, 3))


def fire_reference(x_nchw, w_sq, b_sq, w_e1, b_e1, w_e3, b_e3):
    """Pure-JAX f32 reference using PyTorch-layout (OIHW) conv weights."""
    dn = ('NCHW', 'OIHW', 'NCHW')
    s = lax.conv_general_dilated(x_nchw, w_sq, (1, 1), 'VALID',
                                 dimension_numbers=dn)
    s = jnp.maximum(s + b_sq[None, :, None, None], 0.0)
    e1 = lax.conv_general_dilated(s, w_e1, (1, 1), 'VALID',
                                  dimension_numbers=dn)
    e1 = jnp.maximum(e1 + b_e1[None, :, None, None], 0.0)
    e3 = lax.conv_general_dilated(s, w_e3, (1, 1), ((1, 1), (1, 1)),
                                  dimension_numbers=dn)
    e3 = jnp.maximum(e3 + b_e3[None, :, None, None], 0.0)
    return jnp.concatenate([e1, e3], axis=1)


if __name__ == "__main__":
    # Fire(inplanes=8, squeeze_planes=4, expand1x1_planes=8, expand3x3_planes=8)
    N, Cin, H, W = 4, 8, 16, 16
    Csq, Ce1, Ce3 = 4, 8, 8

    key = jax.random.PRNGKey(0)
    ks = jax.random.split(key, 7)
    x = jax.random.normal(ks[0], (N, Cin, H, W), jnp.float32)

    # PyTorch Conv2d layouts (O, I, kH, kW), deterministic init.
    w_sq = jax.random.normal(ks[1], (Csq, Cin, 1, 1), jnp.float32) * 0.2
    b_sq = jax.random.normal(ks[2], (Csq,), jnp.float32) * 0.1
    w_e1 = jax.random.normal(ks[3], (Ce1, Csq, 1, 1), jnp.float32) * 0.2
    b_e1 = jax.random.normal(ks[4], (Ce1,), jnp.float32) * 0.1
    w_e3 = jax.random.normal(ks[5], (Ce3, Csq, 3, 3), jnp.float32) * 0.2
    b_e3 = jax.random.normal(ks[6], (Ce3,), jnp.float32) * 0.1

    out = fire_pallas(x, w_sq, b_sq, w_e1, b_e1, w_e3, b_e3)
    out = jax.block_until_ready(out)

    ref = fire_reference(x, w_sq, b_sq, w_e1, b_e1, w_e3, b_e3)
    assert out.shape == (N, Ce1 + Ce3, H, W), out.shape
    # bf16 matmul operands (f32 accumulation) -> tolerance loosened vs pure f32.
    assert jnp.allclose(out, ref, rtol=5e-2, atol=5e-2), (
        float(jnp.max(jnp.abs(out - ref))))

    print("KERNEL_OK")
</pallas_src>

<mosaic_0001>
module attributes {stable_mosaic.version = 11 : i64} {
  func.func @fire_kernel(%arg0: i32, %arg1: memref<8x512xf32, #tpu.memory_space<vmem>>, %arg2: memref<4x8xbf16, #tpu.memory_space<vmem>>, %arg3: memref<4x1xf32, #tpu.memory_space<vmem>>, %arg4: memref<8x4xbf16, #tpu.memory_space<vmem>>, %arg5: memref<8x1xf32, #tpu.memory_space<vmem>>, %arg6: memref<9x8x4xbf16, #tpu.memory_space<vmem>>, %arg7: memref<8x1xf32, #tpu.memory_space<vmem>>, %arg8: memref<9x512xf32, #tpu.memory_space<vmem>>, %arg9: memref<16x512xf32, #tpu.memory_space<vmem>>) attributes {dimension_semantics = [#tpu.dimension_semantics<parallel>], iteration_bounds = array<i64: 2>, scalar_prefetch = 0 : i64, scratch_operands = 0 : i64, tpu.core_type = #tpu.core_type<tc>, window_params = [{transform_indices = @transform_0, window_bounds = array<i64: 8, 512>}, {pipeline_mode = #tpu.pipeline_mode<synchronous>, transform_indices = @transform_1, window_bounds = array<i64: 4, 8>}, {pipeline_mode = #tpu.pipeline_mode<synchronous>, transform_indices = @transform_2, window_bounds = array<i64: 4, 1>}, {pipeline_mode = #tpu.pipeline_mode<synchronous>, transform_indices = @transform_3, window_bounds = array<i64: 8, 4>}, {pipeline_mode = #tpu.pipeline_mode<synchronous>, transform_indices = @transform_4, window_bounds = array<i64: 8, 1>}, {pipeline_mode = #tpu.pipeline_mode<synchronous>, transform_indices = @transform_5, window_bounds = array<i64: 9, 8, 4>}, {pipeline_mode = #tpu.pipeline_mode<synchronous>, transform_indices = @transform_6, window_bounds = array<i64: 8, 1>}, {pipeline_mode = #tpu.pipeline_mode<synchronous>, transform_indices = @transform_7, window_bounds = array<i64: 9, 512>}, {transform_indices = @transform_8, window_bounds = array<i64: 16, 512>}]} {
    %c0 = arith.constant 0 : index
    %c0_0 = arith.constant 0 : index
    %0 = vector.load %arg1[%c0, %c0_0] : memref<8x512xf32, #tpu.memory_space<vmem>>, vector<8x512xf32>
    %1 = arith.truncf %0 : vector<8x512xf32> to vector<8x512xbf16>
    %c0_1 = arith.constant 0 : index
    %c0_2 = arith.constant 0 : index
    %2 = vector.load %arg2[%c0_1, %c0_2] : memref<4x8xbf16, #tpu.memory_space<vmem>>, vector<4x8xbf16>
    %cst = arith.constant dense<0.000000e+00> : vector<4x512xf32>
    %3 = tpu.matmul %2, %1, %cst {dimension_numbers = #tpu.dot_dimension_numbers<[1], [0], [0], [1], [0, 0, 1, 1], [], []>} : vector<4x8xbf16>, vector<8x512xbf16>, vector<4x512xf32> -> vector<4x512xf32>
    %c0_3 = arith.constant 0 : index
    %c0_4 = arith.constant 0 : index
    %4 = vector.load %arg3[%c0_3, %c0_4] : memref<4x1xf32, #tpu.memory_space<vmem>>, vector<4x1xf32>
    %5 = vector.broadcast %4 : vector<4x1xf32> to vector<4x512xf32>
    %6 = arith.addf %3, %5 : vector<4x512xf32>
    %cst_5 = arith.constant 0.000000e+00 : f32
    %7 = vector.broadcast %cst_5 : f32 to vector<4x512xf32>
    %8 = arith.maximumf %6, %7 : vector<4x512xf32>
    %9 = arith.truncf %8 : vector<4x512xf32> to vector<4x512xbf16>
    %c0_6 = arith.constant 0 : index
    %c0_7 = arith.constant 0 : index
    %10 = vector.load %arg4[%c0_6, %c0_7] : memref<8x4xbf16, #tpu.memory_space<vmem>>, vector<8x4xbf16>
    %cst_8 = arith.constant dense<0.000000e+00> : vector<8x512xf32>
    %11 = tpu.matmul %10, %9, %cst_8 {dimension_numbers = #tpu.dot_dimension_numbers<[1], [0], [0], [1], [0, 0, 1, 1], [], []>} : vector<8x4xbf16>, vector<4x512xbf16>, vector<8x512xf32> -> vector<8x512xf32>
    %c0_9 = arith.constant 0 : index
    %c0_10 = arith.constant 0 : index
    %12 = vector.load %arg5[%c0_9, %c0_10] : memref<8x1xf32, #tpu.memory_space<vmem>>, vector<8x1xf32>
    %13 = vector.broadcast %12 : vector<8x1xf32> to vector<8x512xf32>
    %14 = arith.addf %11, %13 : vector<8x512xf32>
    %cst_11 = arith.constant 0.000000e+00 : f32
    %15 = vector.broadcast %cst_11 : f32 to vector<8x512xf32>
    %16 = arith.maximumf %14, %15 : vector<8x512xf32>
    %c0_12 = arith.constant 0 : index
    %c0_13 = arith.constant 0 : index
    %17 = vector.load %arg9[%c0_12, %c0_13] : memref<16x512xf32, #tpu.memory_space<vmem>>, vector<8x512xf32>
    tpu.vector_store %arg9[%c0_12, %c0_13], %16 {strides = array<i32>} : memref<16x512xf32, #tpu.memory_space<vmem>>, vector<8x512xf32>,
    %cst_14 = arith.constant 0.000000e+00 : f32
    %18 = vector.broadcast %cst_14 : f32 to vector<8x512xf32>
    %c17_i32 = arith.constant 17 : i32
    %19 = tpu.dynamic_rotate %8 by %c17_i32 dim 1 : vector<4x512xf32>, i32 -> vector<4x512xf32>
    %c0_15 = arith.constant 0 : index
    %c0_16 = arith.constant 0 : index
    %20 = vector.load %arg8[%c0_15, %c0_16] : memref<9x512xf32, #tpu.memory_space<vmem>>, vector<1x512xf32>
    %21 = vector.broadcast %20 : vector<1x512xf32> to vector<4x512xf32>
    %22 = arith.mulf %19, %21 : vector<4x512xf32>
    %23 = arith.truncf %22 : vector<4x512xf32> to vector<4x512xbf16>
    %c0_17 = arith.constant 0 : index
    %c0_18 = arith.constant 0 : index
    %c0_19 = arith.constant 0 : index
    %24 = vector.load %arg6[%c0_17, %c0_18, %c0_19] : memref<9x8x4xbf16, #tpu.memory_space<vmem>>, vector<1x8x4xbf16>
    %25 = vector.shape_cast %24 : vector<1x8x4xbf16> to vector<8x4xbf16>
    %cst_20 = arith.constant dense<0.000000e+00> : vector<8x512xf32>
    %26 = tpu.matmul %25, %23, %cst_20 {dimension_numbers = #tpu.dot_dimension_numbers<[1], [0], [0], [1], [0, 0, 1, 1], [], []>} : vector<8x4xbf16>, vector<4x512xbf16>, vector<8x512xf32> -> vector<8x512xf32>
    %27 = arith.addf %18, %26 : vector<8x512xf32>
    %c16_i32 = arith.constant 16 : i32
    %28 = tpu.dynamic_rotate %8 by %c16_i32 dim 1 : vector<4x512xf32>, i32 -> vector<4x512xf32>
    %c1 = arith.constant 1 : index
    %c0_21 = arith.constant 0 : index
    %29 = vector.load %arg8[%c1, %c0_21] : memref<9x512xf32, #tpu.memory_space<vmem>>, vector<1x512xf32>
    %30 = vector.broadcast %29 : vector<1x512xf32> to vector<4x512xf32>
    %31 = arith.mulf %28, %30 : vector<4x512xf32>
    %32 = arith.truncf %31 : vector<4x512xf32> to vector<4x512xbf16>
    %c1_22 = arith.constant 1 : index
    %c0_23 = arith.constant 0 : index
    %c0_24 = arith.constant 0 : index
    %33 = vector.load %arg6[%c1_22, %c0_23, %c0_24] : memref<9x8x4xbf16, #tpu.memory_space<vmem>>, vector<1x8x4xbf16>
    %34 = vector.shape_cast %33 : vector<1x8x4xbf16> to vector<8x4xbf16>
    %cst_25 = arith.constant dense<0.000000e+00> : vector<8x512xf32>
    %35 = tpu.matmul %34, %32, %cst_25 {dimension_numbers = #tpu.dot_dimension_numbers<[1], [0], [0], [1], [0, 0, 1, 1], [], []>} : vector<8x4xbf16>, vector<4x512xbf16>, vector<8x512xf32> -> vector<8x512xf32>
    %36 = arith.addf %27, %35 : vector<8x512xf32>
    %c15_i32 = arith.constant 15 : i32
    %37 = tpu.dynamic_rotate %8 by %c15_i32 dim 1 : vector<4x512xf32>, i32 -> vector<4x512xf32>
    %c2 = arith.constant 2 : index
    %c0_26 = arith.constant 0 : index
    %38 = vector.load %arg8[%c2, %c0_26] : memref<9x512xf32, #tpu.memory_space<vmem>>, vector<1x512xf32>
    %39 = vector.broadcast %38 : vector<1x512xf32> to vector<4x512xf32>
    %40 = arith.mulf %37, %39 : vector<4x512xf32>
    %41 = arith.truncf %40 : vector<4x512xf32> to vector<4x512xbf16>
    %c2_27 = arith.constant 2 : index
    %c0_28 = arith.constant 0 : index
    %c0_29 = arith.constant 0 : index
    %42 = vector.load %arg6[%c2_27, %c0_28, %c0_29] : memref<9x8x4xbf16, #tpu.memory_space<vmem>>, vector<1x8x4xbf16>
    %43 = vector.shape_cast %42 : vector<1x8x4xbf16> to vector<8x4xbf16>
    %cst_30 = arith.constant dense<0.000000e+00> : vector<8x512xf32>
    %44 = tpu.matmul %43, %41, %cst_30 {dimension_numbers = #tpu.dot_dimension_numbers<[1], [0], [0], [1], [0, 0, 1, 1], [], []>} : vector<8x4xbf16>, vector<4x512xbf16>, vector<8x512xf32> -> vector<8x512xf32>
    %45 = arith.addf %36, %44 : vector<8x512xf32>
    %c1_i32 = arith.constant 1 : i32
    %46 = tpu.dynamic_rotate %8 by %c1_i32 dim 1 : vector<4x512xf32>, i32 -> vector<4x512xf32>
    %c3 = arith.constant 3 : index
    %c0_31 = arith.constant 0 : index
    %47 = vector.load %arg8[%c3, %c0_31] : memref<9x512xf32, #tpu.memory_space<vmem>>, vector<1x512xf32>
    %48 = vector.broadcast %47 : vector<1x512xf32> to vector<4x512xf32>
    %49 = arith.mulf %46, %48 : vector<4x512xf32>
    %50 = arith.truncf %49 : vector<4x512xf32> to vector<4x512xbf16>
    %c3_32 = arith.constant 3 : index
    %c0_33 = arith.constant 0 : index
    %c0_34 = arith.constant 0 : index
    %51 = vector.load %arg6[%c3_32, %c0_33, %c0_34] : memref<9x8x4xbf16, #tpu.memory_space<vmem>>, vector<1x8x4xbf16>
    %52 = vector.shape_cast %51 : vector<1x8x4xbf16> to vector<8x4xbf16>
    %cst_35 = arith.constant dense<0.000000e+00> : vector<8x512xf32>
    %53 = tpu.matmul %52, %50, %cst_35 {dimension_numbers = #tpu.dot_dimension_numbers<[1], [0], [0], [1], [0, 0, 1, 1], [], []>} : vector<8x4xbf16>, vector<4x512xbf16>, vector<8x512xf32> -> vector<8x512xf32>
    %54 = arith.addf %45, %53 : vector<8x512xf32>
    %c4 = arith.constant 4 : index
    %c0_36 = arith.constant 0 : index
    %c0_37 = arith.constant 0 : index
    %55 = vector.load %arg6[%c4, %c0_36, %c0_37] : memref<9x8x4xbf16, #tpu.memory_space<vmem>>, vector<1x8x4xbf16>
    %56 = vector.shape_cast %55 : vector<1x8x4xbf16> to vector<8x4xbf16>
    %cst_38 = arith.constant dense<0.000000e+00> : vector<8x512xf32>
    %57 = tpu.matmul %56, %9, %cst_38 {dimension_numbers = #tpu.dot_dimension_numbers<[1], [0], [0], [1], [0, 0, 1, 1], [], []>} : vector<8x4xbf16>, vector<4x512xbf16>, vector<8x512xf32> -> vector<8x512xf32>
    %58 = arith.addf %54, %57 : vector<8x512xf32>
    %c511_i32 = arith.constant 511 : i32
    %59 = tpu.dynamic_rotate %8 by %c511_i32 dim 1 : vector<4x512xf32>, i32 -> vector<4x512xf32>
    %c5 = arith.constant 5 : index
    %c0_39 = arith.constant 0 : index
    %60 = vector.load %arg8[%c5, %c0_39] : memref<9x512xf32, #tpu.memory_space<vmem>>, vector<1x512xf32>
    %61 = vector.broadcast %60 : vector<1x512xf32> to vector<4x512xf32>
    %62 = arith.mulf %59, %61 : vector<4x512xf32>
    %63 = arith.truncf %62 : vector<4x512xf32> to vector<4x512xbf16>
    %c5_40 = arith.constant 5 : index
    %c0_41 = arith.constant 0 : index
    %c0_42 = arith.constant 0 : index
    %64 = vector.load %arg6[%c5_40, %c0_41, %c0_42] : memref<9x8x4xbf16, #tpu.memory_space<vmem>>, vector<1x8x4xbf16>
    %65 = vector.shape_cast %64 : vector<1x8x4xbf16> to vector<8x4xbf16>
    %cst_43 = arith.constant dense<0.000000e+00> : vector<8x512xf32>
    %66 = tpu.matmul %65, %63, %cst_43 {dimension_numbers = #tpu.dot_dimension_numbers<[1], [0], [0], [1], [0, 0, 1, 1], [], []>} : vector<8x4xbf16>, vector<4x512xbf16>, vector<8x512xf32> -> vector<8x512xf32>
    %67 = arith.addf %58, %66 : vector<8x512xf32>
    %c497_i32 = arith.constant 497 : i32
    %68 = tpu.dynamic_rotate %8 by %c497_i32 dim 1 : vector<4x512xf32>, i32 -> vector<4x512xf32>
    %c6 = arith.constant 6 : index
    %c0_44 = arith.constant 0 : index
    %69 = vector.load %arg8[%c6, %c0_44] : memref<9x512xf32, #tpu.memory_space<vmem>>, vector<1x512xf32>
    %70 = vector.broadcast %69 : vector<1x512xf32> to vector<4x512xf32>
    %71 = arith.mulf %68, %70 : vector<4x512xf32>
    %72 = arith.truncf %71 : vector<4x512xf32> to vector<4x512xbf16>
    %c6_45 = arith.constant 6 : index
    %c0_46 = arith.constant 0 : index
    %c0_47 = arith.constant 0 : index
    %73 = vector.load %arg6[%c6_45, %c0_46, %c0_47] : memref<9x8x4xbf16, #tpu.memory_space<vmem>>, vector<1x8x4xbf16>
    %74 = vector.shape_cast %73 : vector<1x8x4xbf16> to vector<8x4xbf16>
    %cst_48 = arith.constant dense<0.000000e+00> : vector<8x512xf32>
    %75 = tpu.matmul %74, %72, %cst_48 {dimension_numbers = #tpu.dot_dimension_numbers<[1], [0], [0], [1], [0, 0, 1, 1], [], []>} : vector<8x4xbf16>, vector<4x512xbf16>, vector<8x512xf32> -> vector<8x512xf32>
    %76 = arith.addf %67, %75 : vector<8x512xf32>
    %c496_i32 = arith.constant 496 : i32
    %77 = tpu.dynamic_rotate %8 by %c496_i32 dim 1 : vector<4x512xf32>, i32 -> vector<4x512xf32>
    %c7 = arith.constant 7 : index
    %c0_49 = arith.constant 0 : index
    %78 = vector.load %arg8[%c7, %c0_49] : memref<9x512xf32, #tpu.memory_space<vmem>>, vector<1x512xf32>
    %79 = vector.broadcast %78 : vector<1x512xf32> to vector<4x512xf32>
    %80 = arith.mulf %77, %79 : vector<4x512xf32>
    %81 = arith.truncf %80 : vector<4x512xf32> to vector<4x512xbf16>
    %c7_50 = arith.constant 7 : index
    %c0_51 = arith.constant 0 : index
    %c0_52 = arith.constant 0 : index
    %82 = vector.load %arg6[%c7_50, %c0_51, %c0_52] : memref<9x8x4xbf16, #tpu.memory_space<vmem>>, vector<1x8x4xbf16>
    %83 = vector.shape_cast %82 : vector<1x8x4xbf16> to vector<8x4xbf16>
    %cst_53 = arith.constant dense<0.000000e+00> : vector<8x512xf32>
    %84 = tpu.matmul %83, %81, %cst_53 {dimension_numbers = #tpu.dot_dimension_numbers<[1], [0], [0], [1], [0, 0, 1, 1], [], []>} : vector<8x4xbf16>, vector<4x512xbf16>, vector<8x512xf32> -> vector<8x512xf32>
    %85 = arith.addf %76, %84 : vector<8x512xf32>
    %c495_i32 = arith.constant 495 : i32
    %86 = tpu.dynamic_rotate %8 by %c495_i32 dim 1 : vector<4x512xf32>, i32 -> vector<4x512xf32>
    %c8 = arith.constant 8 : index
    %c0_54 = arith.constant 0 : index
    %87 = vector.load %arg8[%c8, %c0_54] : memref<9x512xf32, #tpu.memory_space<vmem>>, vector<1x512xf32>
    %88 = vector.broadcast %87 : vector<1x512xf32> to vector<4x512xf32>
    %89 = arith.mulf %86, %88 : vector<4x512xf32>
    %90 = arith.truncf %89 : vector<4x512xf32> to vector<4x512xbf16>
    %c8_55 = arith.constant 8 : index
    %c0_56 = arith.constant 0 : index
    %c0_57 = arith.constant 0 : index
    %91 = vector.load %arg6[%c8_55, %c0_56, %c0_57] : memref<9x8x4xbf16, #tpu.memory_space<vmem>>, vector<1x8x4xbf16>
    %92 = vector.shape_cast %91 : vector<1x8x4xbf16> to vector<8x4xbf16>
    %cst_58 = arith.constant dense<0.000000e+00> : vector<8x512xf32>
    %93 = tpu.matmul %92, %90, %cst_58 {dimension_numbers = #tpu.dot_dimension_numbers<[1], [0], [0], [1], [0, 0, 1, 1], [], []>} : vector<8x4xbf16>, vector<4x512xbf16>, vector<8x512xf32> -> vector<8x512xf32>
    %94 = arith.addf %85, %93 : vector<8x512xf32>
    %c0_59 = arith.constant 0 : index
    %c0_60 = arith.constant 0 : index
    %95 = vector.load %arg7[%c0_59, %c0_60] : memref<8x1xf32, #tpu.memory_space<vmem>>, vector<8x1xf32>
    %96 = vector.broadcast %95 : vector<8x1xf32> to vector<8x512xf32>
    %97 = arith.addf %94, %96 : vector<8x512xf32>
    %cst_61 = arith.constant 0.000000e+00 : f32
    %98 = vector.broadcast %cst_61 : f32 to vector<8x512xf32>
    %99 = arith.maximumf %97, %98 : vector<8x512xf32>
    %c8_62 = arith.constant 8 : index
    %c0_63 = arith.constant 0 : index
    %100 = vector.load %arg9[%c8_62, %c0_63] : memref<16x512xf32, #tpu.memory_space<vmem>>, vector<8x512xf32>
    tpu.vector_store %arg9[%c8_62, %c0_63], %99 {strides = array<i32>} : memref<16x512xf32, #tpu.memory_space<vmem>>, vector<8x512xf32>,
    return
  }
  func.func @transform_0(%arg0: i32) -> (i32, i32) {
    %c0_i32 = arith.constant 0 : i32
    %c0_i32_0 = arith.constant 0 : i32
    return %c0_i32, %arg0 : i32, i32
  }
  func.func @transform_1(%arg0: i32) -> (i32, i32) {
    %c0_i32 = arith.constant 0 : i32
    %c0_i32_0 = arith.constant 0 : i32
    %c0_i32_1 = arith.constant 0 : i32
    return %c0_i32, %c0_i32_0 : i32, i32
  }
  func.func @transform_2(%arg0: i32) -> (i32, i32) {
    %c0_i32 = arith.constant 0 : i32
    %c0_i32_0 = arith.constant 0 : i32
    %c0_i32_1 = arith.constant 0 : i32
    return %c0_i32, %c0_i32_0 : i32, i32
  }
  func.func @transform_3(%arg0: i32) -> (i32, i32) {
    %c0_i32 = arith.constant 0 : i32
    %c0_i32_0 = arith.constant 0 : i32
    %c0_i32_1 = arith.constant 0 : i32
    return %c0_i32, %c0_i32_0 : i32, i32
  }
  func.func @transform_4(%arg0: i32) -> (i32, i32) {
    %c0_i32 = arith.constant 0 : i32
    %c0_i32_0 = arith.constant 0 : i32
    %c0_i32_1 = arith.constant 0 : i32
    return %c0_i32, %c0_i32_0 : i32, i32
  }
  func.func @transform_5(%arg0: i32) -> (i32, i32, i32) {
    %c0_i32 = arith.constant 0 : i32
    %c0_i32_0 = arith.constant 0 : i32
    %c0_i32_1 = arith.constant 0 : i32
    %c0_i32_2 = arith.constant 0 : i32
    return %c0_i32, %c0_i32_0, %c0_i32_1 : i32, i32, i32
  }
  func.func @transform_6(%arg0: i32) -> (i32, i32) {
    %c0_i32 = arith.constant 0 : i32
    %c0_i32_0 = arith.constant 0 : i32
    %c0_i32_1 = arith.constant 0 : i32
    return %c0_i32, %c0_i32_0 : i32, i32
  }
  func.func @transform_7(%arg0: i32) -> (i32, i32) {
    %c0_i32 = arith.constant 0 : i32
    %c0_i32_0 = arith.constant 0 : i32
    %c0_i32_1 = arith.constant 0 : i32
    return %c0_i32, %c0_i32_0 : i32, i32
  }
  func.func @transform_8(%arg0: i32) -> (i32, i32) {
    %c0_i32 = arith.constant 0 : i32
    %c0_i32_0 = arith.constant 0 : i32
    return %c0_i32, %arg0 : i32, i32
  }
}

</mosaic_0001>

<bundles_post_ra>
// kernel: tpu_custom_call.1
= control target key start
LH: loop header
LB: loop body
LE: loop exit
PB: predicated region body
PF: predicated region fallthrough
CT: control target
= control target key end

     0   :  { %13 = vsyncpa [#allocation3], 0  ;;  %s2172_s0 = inlined_call_operand.vmem [shape: f32[8,1024], index: 0, kind: input, shape index: {}]   ;;  %s2173_s1 = inlined_call_operand.vmem [shape: bf16[4,8], index: 1, kind: input, shape index: {}]   ;;  %s2174_s2 = inlined_call_operand.vmem [shape: f32[4,1], index: 2, kind: input, shape index: {}]   ;;  %s2175_s3 = inlined_call_operand.vmem [shape: bf16[8,4], index: 3, kind: input, shape index: {}]   ;;  %s2176_s4 = inlined_call_operand.vmem [shape: f32[8,1], index: 4, kind: input, shape index: {}]   ;;  %s2177_s5 = inlined_call_operand.vmem [shape: bf16[9,8,4], index: 5, kind: input, shape index: {}]   ;;  %s2178_s6 = inlined_call_operand.vmem [shape: f32[8,1], index: 6, kind: input, shape index: {}]   ;;  %s2179_s7 = inlined_call_operand.hbm [shape: f32[9,512], index: 7, kind: input, shape index: {}]   ;;  %s2180_s8 = inlined_call_operand.hbm [shape: f32[16,1024], index: 8, kind: output, shape index: {}]  }
   0x1   :  { %14 = vsyncpa [#allocation4], 0 }
   0x2   :  { %16 = vsyncpa [#allocation4 + $0x1], 0  ;;  %s1793_s27 = smov 0   ;;  %s1795_s28 = smov 0  }
   0x3   :  { %s1797_s29 = smov 0   ;;  %s1799_s30 = smov 0  }
   0x4 LB: > { %s1814_s9 = sadd.s32 4294967295, %s1731_s30   ;;  %s1502_s10 = sadd.s32 4294967294, %s1731_s30   ;;  %s1731_s30 = sphi %s1799_s30, %s2186_s30   ;;  %s1727_s29 = sphi %s1797_s29, %s2185_s29   ;;  %s1723_s28 = sphi %s1795_s28, %s2184_s28   ;;  %s1719_s27 = sphi %s1793_s27, %s2183_s27  }
   0x5   : > { %s1818_s11 = sadd.s32 1, %s1731_s30   ;;  %s202_s12 = sadd.s32 1, %s1727_s29 }
   0x6   : > { %s199_s13 = ssub.s32 %s1731_s30, %s1818_s11  ;;  %p212_p0 = scmp.ne.s32.totalorder %s1727_s29, %s1723_s28 }
   0x7   : > { %p200_p1 = scmp.eq.s32.totalorder %s199_s13, 0  ;;  %p213_p2 = scmp.eq.s32.totalorder %s1814_s9, 1 }
   0x8   : > { %p218_p3 = scmp.ne.s32.totalorder %s1723_s28, %s1719_s27  ;;  %p219_p4 = scmp.eq.s32.totalorder %s1502_s10, 1 }
   0x9   : > { %s1829_s14 = scalar_select %p200_p1, %s1727_s29, %s202_s12  }
   0xa   : > { %p1831_p5 = por %p213_p2, %p212_p0  ;;  %p1835_p6 = por %p219_p4, %p218_p3 }
   0xb   : > { %p1503_p7 = scmp.ge.s32.totalorder %s1731_s30, 1  ;;  %p226_p8 = scmp.lt.s32.totalorder %s1731_s30, 3 }
   0xc   : > { %p1583_p9 = scmp.eq.s32.totalorder %s1814_s9, 0  ;;  %s255_s19 = sshll.u32 %s2179_s7, 4  ;;  %s256_s19 = int_to_ptr.hbm [resolvable:$true] %s255_s19 }
   0xd   : > { %p227_p10 = pnand %p1503_p7, %p226_p8  ;;  %s1733_s20 = smov [#allocation2]  }
   0xe   : > { %s257_s21 = sshll.u32 %s1733_s20, 4  ;;  %s1734_s22 = smov 512   ;;  %s258_s21 = int_to_ptr.vmem [resolvable:$true] %s257_s21 }
   0xf   : > { %p1575_p11 = pneg %p227_p10  ;;  %s1735_s23 = smov 32  }
  0x10   : > { %282 = sbr.rel (%p227_p10) target bundleno = 576 (0x240), region = 52 }
  0x11   : > { %p1576_p12 = pnand %p1583_p9, %p1575_p11 }
  0x13   : > { %1578 = dma.hbm_to_vmem [thread:$0]  (!%p1576_p12), %s256_s19, 1024, %s258_s21, [#allocation3], %s1734_s22, %s1734_s22, %s1735_s23  }
  0x15   : > { %1710 = dma.done.wait (%p1583_p9), [#allocation3], 1024  }
  0x16   : > { %1712 = vsyncadd (%p1583_p9), [#allocation3], 4294966272  ;;  %s1509_s24 = sshll.u32 %s1814_s9, 2  ;;  %v1736_v0 = vmov 0   ;;  %vm344_vm0 = vcmask 1043456   ;;  %vm340_vm1 = vcmask 64512   ;;  %v509_v44 = vlaneseq }
  0x17   : > { %p318_p13 = scmp.lt.s32.totalorder %s1509_s24, 7  ;;  %1633 = vset.pattern.permute.xlu0 %v1736_v0  ;;  %1634 = vset.pattern.permute.xlu1 %v1736_v0  ;;  %v334_v8 = vld [vmem:[%s2174_s2] sm:$0xf]  ;;  %vm428_vm2 = vcmask 1041408   ;;  %s1737_s20 = smov 16   ;;  %vm424_vm3 = vcmask 31744  }
  0x18   : > { %337 = vperm.xlu0 %1633, %v334_v8   ;;  %v333_v14 = vld [vmem:[%s2173_s1] sm:$0x3]  ;;  %s1738_s21 = smov 17   ;;  %s1739_s22 = smov 15   ;;  %v1911_v45 = vand.u32 127, %v509_v44 }
  0x19   : > { %s2188_s24 = smov (!%p318_p13, %s1509_s24), 7  ;;  %v417_v40 = vld [vmem:[%s2175_s3] sm:$0xf]  ;;  %s1741_s26 = smov 127   ;;  %v1519_v63 = vld [vmem:[%s2177_s5 + $0x4] sm:$0xf] }
  0x1a   : > { %s1510_s25 = sshll.u32 %s2188_s24, 3  ;;  %s1742_s10 = smov 113   ;;  %v418_v41 = vld [vmem:[%s2176_s4] sm:$0xff]  ;;  %vm511_vm4 = vcmp.lt.s32.totalorder %v1911_v45, 17  ;;  %vm543_vm5 = vcmp.lt.s32.totalorder %v1911_v45, 16  ;;  %vm711_vm6 = vcmp.lt.s32.totalorder %v1911_v45, 15 }
  0x1b   : > { %s321_s12 = scalar_lea.vmem %s2172_s0, %s1510_s25  ;;  %s1740_s25 = smov 1   ;;  %v1913_v46 = vld [vmem:[#allocation2] ss:$8 sm:$0xf]  ;;  %vm816_vm7 = vcmp.lt.s32.totalorder %v1911_v45, 1  ;;  %vm982_vm8 = vcmp.lt.s32.totalorder %v1911_v45, 127 }
  0x1c   : > { %v325_v1 = vld [vmem:[%s321_s12] sm:$0xff]  ;;  %v326_v2 = vld [vmem:[%s321_s12 + $0x8] sm:$0xff]  ;;  %v327_v3 = vld [vmem:[%s321_s12 + $0x10] sm:$0xff]  ;;  %s1744_s13 = smov 111   ;;  %v519_v48 = vperm.slane %v1913_v46, 1  ;;  %v520_v60 = vperm.slane %v1913_v46, 2 }
  0x1d   : > { %v329_v4 = vpack.c.bf16 %v325_v1, %v325_v1  ;;  %v330_v5 = vpack.c.bf16 %v326_v2, %v326_v2  ;;  %v331_v6 = vpack.c.bf16 %v327_v3, %v327_v3  ;;  %v328_v7 = vld [vmem:[%s321_s12 + $0x18] sm:$0xff]  ;;  %s1743_s12 = smov 112   ;;  %vm1087_vm9 = vcmp.lt.s32.totalorder %v1911_v45, 113 }
  0x1e   : > { %v332_v9 = vpack.c.bf16 %v328_v7, %v328_v7  ;;  %v549_v49 = vld [vmem:[#allocation2 + $0x1] ss:$8 sm:$0xf]  ;;  %vm1192_vm10 = vcmp.lt.s32.totalorder %v1911_v45, 112  ;;  %vm1297_vm11 = vcmp.lt.s32.totalorder %v1911_v45, 111 }
  0x1f   : > { %v346_v10 = vsel %vm344_vm0, %v329_v4, 0  ;;  %v349_v11 = vsel %vm344_vm0, %v330_v5, 0  ;;  %v352_v12 = vsel %vm344_vm0, %v331_v6, 0  ;;  %v552_v51 = vperm.slane %v549_v49, 1 }
  0x20   : > { %364 = vmatpush.bf16.msra.mxu0 %v346_v10  ;;  %377 = vmatpush.bf16.msra.mxu1 %v349_v11  ;;  %v355_v13 = vsel %vm344_vm0, %v332_v9, 0  ;;  %v553_v58 = vperm.slane %v549_v49, 2  ;;  %v551_v8 = vperm.slane %v549_v49, 0  ;;  %v554_v9 = vperm.slane %v549_v49, 3 }
  0x21   : > { %390 = vmatpush.bf16.msra.mxu2 %v352_v12  ;;  %403 = vmatpush.bf16.msra.mxu3 %v355_v13 }
  0x23   : > { %1511 = vmatmul.msk.bf16.vlgmr.msra.gmra.mxu0 %vm340_vm1, %v333_v14  ;;  %1512 = vmatmul.msk.bf16.vlgmr.msra.gmra.mxu1 %vm340_vm1, %v333_v14 }
  0x24   : > { %1513 = vmatmul.msk.bf16.vlgmr.msra.gmra.mxu2 %vm340_vm1, %v333_v14  ;;  %1514 = vmatmul.msk.bf16.vlgmr.msra.gmra.mxu3 %vm340_vm1, %v333_v14 }
  0x8a   : > { %v338_v15 = vpop.permute.xlu0 %337 }
  0xa0   : > { %v366_v16 = vpop.f32.mrf.mxu0  ;;  %v379_v17 = vpop.f32.mrf.mxu1 }
  0xa1   : > { %v367_v18 = vadd.f32 %v366_v16, %v338_v15  ;;  %v380_v19 = vadd.f32 %v379_v17, %v338_v15 }
  0xa3   : > { %v1861_v20 = vmax.f32 %v367_v18, 0.0  ;;  %v1863_v21 = vmax.f32 %v380_v19, 0.0 }
  0xa5   : > { %537 = vrot.lane.b32.xlu0 %v1863_v21, %s1737_s20  ;;  %535 = vrot.lane.b32.xlu2 %v1861_v20, %s1737_s20  ;;  %v413_v22 = vpack.c.bf16 %v1861_v20, %v1861_v20  ;;  %v414_v23 = vpack.c.bf16 %v1863_v21, %v1863_v21 }
  0xa7   : > { %v392_v24 = vpop.f32.mrf.mxu2  ;;  %v405_v25 = vpop.f32.mrf.mxu3  ;;  %v1872_v26 = vsel %vm428_vm2, %v413_v22, 0  ;;  %v1875_v27 = vsel %vm428_vm2, %v414_v23, 0  ;;  %v518_v23 = vperm.slane %v1913_v46, 0 }
  0xa8   : > { %v393_v28 = vadd.f32 %v392_v24, %v338_v15  ;;  %v406_v29 = vadd.f32 %v405_v25, %v338_v15  ;;  %v381_v30 = vpop.f32.mrf.mxu1  ;;  %448 = vmatpush.bf16.msrb.mxu0 %v1872_v26  ;;  %461 = vmatpush.bf16.msrb.mxu1 %v1875_v27  ;;  %v368_v31 = vpop.f32.mrf.mxu0  ;;  %v521_v24 = vperm.slane %v1913_v46, 3  ;;  %v822_v46 = vld [vmem:[#allocation2 + $0x3] ss:$8 sm:$0xf] }
  0xa9   : > { %v534_v30 = vld [vmem:[%s2177_s5] sm:$0xf] }
  0xaa   : > { %v411_v32 = vmax.f32 %v393_v28, 0.0  ;;  %v412_v33 = vmax.f32 %v406_v29, 0.0 }
  0xab   : > { %1515 = vmatmul.msk.bf16.vlgmr.msrb.gmra.mxu0 %vm424_vm3, %v417_v40  ;;  %1516 = vmatmul.msk.bf16.vlgmr.msrb.gmra.mxu1 %vm424_vm3, %v417_v40 }
  0xac   : > { %539 = vrot.lane.b32.xlu1 %v411_v32, %s1737_s20  ;;  %v415_v34 = vpack.c.bf16 %v411_v32, %v411_v32  ;;  %v416_v35 = vpack.c.bf16 %v412_v33, %v412_v33 }
  0xad   : > { %505 = vrot.lane.b32.xlu0 %v411_v32, %s1738_s21  ;;  %503 = vrot.lane.b32.xlu2 %v1863_v21, %s1738_s21 }
  0xae   : > { %v1881_v36 = vsel %vm428_vm2, %v415_v34, 0  ;;  %v1884_v37 = vsel %vm428_vm2, %v416_v35, 0 }
  0xaf   : > { %v394_v38 = vpop.f32.mrf.mxu2  ;;  %v407_v39 = vpop.f32.mrf.mxu3  ;;  %474 = vmatpush.bf16.msrb.mxu2 %v1881_v36  ;;  %487 = vmatpush.bf16.msrb.mxu3 %v1884_v37 }
  0xb2   : > { %1517 = vmatmul.msk.bf16.vlgmr.msrb.gmra.mxu2 %vm424_vm3, %v417_v40  ;;  %1518 = vmatmul.msk.bf16.vlgmr.msrb.gmra.mxu3 %vm424_vm3, %v417_v40 }
  0xb4   : > { %541 = vrot.lane.b32.xlu1 %v412_v33, %s1737_s20 }
  0xb5   : > { %705 = vrot.lane.b32.xlu0 %v1863_v21, %s1739_s22  ;;  %501 = vrot.lane.b32.xlu2 %v1861_v20, %s1738_s21 }
  0xbc   : > { %507 = vrot.lane.b32.xlu1 %v412_v33, %s1738_s21 }
  0xbd   : > { %703 = vrot.lane.b32.xlu0 %v1861_v20, %s1739_s22  ;;  %709 = vrot.lane.b32.xlu2 %v412_v33, %s1739_s22 }
  0xc4   : > { %707 = vrot.lane.b32.xlu1 %v411_v32, %s1739_s22 }
  0xc5   : > { %814 = vrot.lane.b32.xlu0 %v412_v33, %s1740_s25  ;;  %812 = vrot.lane.b32.xlu2 %v411_v32, %s1740_s25 }
  0xcc   : > { %810 = vrot.lane.b32.xlu1 %v1863_v21, %s1740_s25 }
  0xcd   : > { %978 = vrot.lane.b32.xlu0 %v411_v32, %s1741_s26  ;;  %974 = vrot.lane.b32.xlu2 %v1861_v20, %s1741_s26 }
  0xd4   : > { %808 = vrot.lane.b32.xlu1 %v1861_v20, %s1740_s25 }
  0xd5   : > { %1079 = vrot.lane.b32.xlu0 %v1861_v20, %s1742_s10  ;;  %976 = vrot.lane.b32.xlu2 %v1863_v21, %s1741_s26 }
  0xdc   : > { %980 = vrot.lane.b32.xlu1 %v412_v33, %s1741_s26 }
  0xdd   : > { %1081 = vrot.lane.b32.xlu0 %v1863_v21, %s1742_s10  ;;  %1085 = vrot.lane.b32.xlu2 %v412_v33, %s1742_s10 }
  0xe4   : > { %1083 = vrot.lane.b32.xlu1 %v411_v32, %s1742_s10 }
  0xe5   : > { %1190 = vrot.lane.b32.xlu0 %v412_v33, %s1743_s12  ;;  %1188 = vrot.lane.b32.xlu2 %v411_v32, %s1743_s12 }
  0xec   : > { %1184 = vrot.lane.b32.xlu1 %v1861_v20, %s1743_s12 }
  0xed   : > { %1293 = vrot.lane.b32.xlu0 %v411_v32, %s1744_s13  ;;  %1289 = vrot.lane.b32.xlu2 %v1861_v20, %s1744_s13  ;;  %v717_v20 = vld [vmem:[#allocation2 + $0x2] ss:$8 sm:$0xf] }
  0xee   : > { %v719_v25 = vperm.slane %v717_v20, 0  ;;  %v720_v28 = vperm.slane %v717_v20, 1 }
  0xf4   : > { %1186 = vrot.lane.b32.xlu1 %v1863_v21, %s1743_s12  ;;  %s1685_s12 = scalar_lea.hbm %s2180_s8, 128 }
  0xf5   : > { %421 = vperm.xlu0 %1633, %v418_v41   ;;  %1291 = vrot.lane.b32.xlu2 %v1863_v21, %s1744_s13 }
  0xfc   : > { %1295 = vrot.lane.b32.xlu1 %v412_v33, %s1744_s13  ;;  %s314_s13 = sand.u32 1, %s1723_s28  }
  0xfd   : > { %s1508_s17 = sshll.u32 %s314_s13, 6 }
  0xfe   : > { %s2064_s18 = scalar_lea.vmem [#allocation5], %s1508_s17  ;;  %s1568_s17 = sshll.u32 %s1814_s9, 5 }
  0xff   : > { %v536_v42 = vpop.permute.xlu2 %535  ;;  %s1424_s21 = scalar_lea.hbm %s2180_s8, %s1568_s17  ;;  %s1425_s22 = sshll.u32 %s2064_s18, 4  ;;  %s1426_s22 = int_to_ptr.vmem [resolvable:$true] %s1425_s22 }
 0x100   : > { %s1427_s23 = sshll.u32 %s1424_s21, 4  ;;  %s1413_s9 = scalar_lea.sflag [#allocation4], %s314_s13  ;;  %s1428_s23 = int_to_ptr.hbm [resolvable:$true] %s1427_s23 }
 0x101   : > { %s1679_s24 = sshra.s32 %s1428_s23, 4  ;;  %s1680_s24 = int_to_ptr.hbm [resolvable:$true] %s1679_s24 }
 0x102   : > { %s1681_s25 = scalar_lea.hbm %s1680_s24, 64  ;;  %p1686_p3 = scmp.lt.s32.totalorder %s1680_s24, %s2180_s8 }
 0x103   : > { %p1682_p0 = scmp.ne.s32.totalorder %s1680_s24, %s1681_s25  ;;  %p1687_p4 = scmp.lt.s32.totalorder %s1685_s12, %s1681_s25 }
 0x105   : > { %p1683_p1 = pnand %p1682_p0, %p1831_p5  ;;  %p1688_p7 = por %p1687_p4, %p1686_p3 }
 0x107   : > { %v504_v43 = vpop.permute.xlu2 %503  ;;  %p1684_p2 = pneg %p1683_p1 }
 0x109   : > { %p1689_p8 = pnand %p1688_p7, %p1684_p2 }
 0x10f   : > { %v502_v47 = vpop.permute.xlu2 %501 }
 0x110   : > { %v514_v50 = vsel %vm511_vm4, %v502_v47, %v504_v43 }
 0x111   : > { %v527_v52 = vmul.f32 %v519_v48, %v514_v50 }
 0x113   : > { %v531_v56 = vpack.c.bf16 %v527_v52, %v527_v52  ;;  %v722_v52 = vperm.slane %v717_v20, 3 }
 0x115   : > { %v643_v62 = vsel %vm428_vm2, %v531_v56, 0 }
 0x117   : > { %v538_v53 = vpop.permute.xlu0 %537  ;;  %v710_v15 = vpop.permute.xlu2 %709 }
 0x118   : > { %v546_v54 = vsel %vm543_vm5, %v536_v42, %v538_v53 }
 0x119   : > { %v560_v55 = vmul.f32 %v552_v51, %v546_v54  ;;  %v721_v51 = vperm.slane %v717_v20, 2 }
 0x11b   : > { %v564_v57 = vpack.c.bf16 %v560_v55, %v560_v55  ;;  %v827_v55 = vperm.slane %v822_v46, 3 }
 0x11d   : > { %v576_v59 = vsel %vm428_vm2, %v564_v57, 0 }
 0x11e   : > { %v540_v61 = vpop.permute.xlu1 %539  ;;  %604 = vmatpush.bf16.msra.mxu1 %v576_v59 }
 0x11f   : > { %v545_v0 = vsel %vm543_vm5, %v538_v53, %v540_v61  ;;  %v506_v1 = vpop.permute.xlu0 %505 }
 0x120   : > { %v561_v2 = vmul.f32 %v553_v58, %v545_v0  ;;  %v513_v3 = vsel %vm511_vm4, %v504_v43, %v506_v1 }
 0x121   : > { %v528_v4 = vmul.f32 %v520_v60, %v513_v3  ;;  %1521 = vmatmul.msk.bf16.vlgmr.msra.gmra.mxu1 %vm424_vm3, %v1519_v63 }
 0x122   : > { %671 = vmatpush.bf16.msrb.mxu1 %v643_v62  ;;  %v565_v5 = vpack.c.bf16 %v561_v2, %v561_v2 }
 0x123   : > { %v532_v6 = vpack.c.bf16 %v528_v4, %v528_v4 }
 0x124   : > { %v579_v7 = vsel %vm428_vm2, %v565_v5, 0 }
 0x125   : > { %617 = vmatpush.bf16.msra.mxu2 %v579_v7  ;;  %v646_v10 = vsel %vm428_vm2, %v532_v6, 0  ;;  %v826_v6 = vperm.slane %v822_v46, 2 }
 0x126   : > { %v542_v11 = vpop.permute.xlu1 %541 }
 0x127   : > { %v544_v12 = vsel %vm543_vm5, %v540_v61, %v542_v11  ;;  %v547_v13 = vsel %vm543_vm5, %v542_v11, %v536_v42  ;;  %v706_v14 = vpop.permute.xlu0 %705  ;;  %v813_v42 = vpop.permute.xlu2 %812  ;;  %v1528_v11 = vld [vmem:[%s2177_s5 + $0x8] sm:$0xf] }
 0x128   : > { %v559_v16 = vmul.f32 %v551_v8, %v547_v13  ;;  %v562_v17 = vmul.f32 %v554_v9, %v544_v12  ;;  %1522 = vmatmul.msk.bf16.vlgmr.msra.gmra.mxu2 %vm424_vm3, %v1519_v63 }
 0x129   : > { %684 = vmatpush.bf16.msrb.mxu2 %v646_v10 }
 0x12a   : > { %v563_v18 = vpack.c.bf16 %v559_v16, %v559_v16  ;;  %v566_v19 = vpack.c.bf16 %v562_v17, %v562_v17  ;;  %v825_v16 = vperm.slane %v822_v46, 1  ;;  %v988_v17 = vld [vmem:[#allocation2 + $0x5] ss:$8 sm:$0xf] }
 0x12c   : > { %v573_v21 = vsel %vm428_vm2, %v563_v18, 0  ;;  %v582_v22 = vsel %vm428_vm2, %v566_v19, 0  ;;  %v991_v19 = vperm.slane %v988_v17, 1 }
 0x12d   : > { %591 = vmatpush.bf16.msra.mxu0 %v573_v21  ;;  %630 = vmatpush.bf16.msra.mxu3 %v582_v22 }
 0x12e   : > { %v508_v29 = vpop.permute.xlu1 %507 }
 0x12f   : > { %v512_v31 = vsel %vm511_vm4, %v506_v1, %v508_v29  ;;  %v515_v32 = vsel %vm511_vm4, %v508_v29, %v502_v47  ;;  %v704_v33 = vpop.permute.xlu0 %703  ;;  %v1971_v3 = vpop.permute.xlu2 %974 }
 0x130   : > { %v526_v34 = vmul.f32 %v518_v23, %v515_v32  ;;  %v529_v35 = vmul.f32 %v521_v24, %v512_v31  ;;  %1523 = vmatmul.msk.bf16.vlgmr.msra.gmra.mxu3 %vm424_vm3, %v1519_v63  ;;  %v714_v38 = vsel %vm711_vm6, %v704_v33, %v706_v14  ;;  %v715_v39 = vsel %vm711_vm6, %v710_v15, %v704_v33  ;;  %v1996_v32 = vpop.f32.mrf.mxu1 }
 0x131   : > { %v727_v40 = vmul.f32 %v719_v25, %v715_v39  ;;  %v728_v41 = vmul.f32 %v720_v28, %v714_v38  ;;  %1520 = vmatmul.msk.bf16.vlgmr.msra.gmra.mxu0 %vm424_vm3, %v1519_v63  ;;  %1525 = vmatmul.msk.bf16.vlgmr.msrb.gmra.mxu1 %vm424_vm3, %v534_v30 }
 0x132   : > { %v530_v43 = vpack.c.bf16 %v526_v34, %v526_v34  ;;  %v533_v44 = vpack.c.bf16 %v529_v35, %v529_v35  ;;  %v2002_v35 = vpop.f32.mrf.mxu0 }
 0x133   : > { %v731_v47 = vpack.c.bf16 %v727_v40, %v727_v40  ;;  %v732_v48 = vpack.c.bf16 %v728_v41, %v728_v41  ;;  %v992_v40 = vperm.slane %v988_v17, 2 }
 0x134   : > { %v640_v49 = vsel %vm428_vm2, %v530_v43, 0  ;;  %v649_v50 = vsel %vm428_vm2, %v533_v44, 0  ;;  %v1533_v44 = vld [vmem:[%s2177_s5 + $0xc] sm:$0xf] }
 0x135   : > { %658 = vmatpush.bf16.msrb.mxu0 %v640_v49  ;;  %697 = vmatpush.bf16.msrb.mxu3 %v649_v50  ;;  %v741_v53 = vsel %vm428_vm2, %v731_v47, 0  ;;  %v744_v54 = vsel %vm428_vm2, %v732_v48, 0  ;;  %v1998_v33 = vpop.f32.mrf.mxu2  ;;  %v2000_v34 = vpop.f32.mrf.mxu3 }
 0x136   : > { %v708_v56 = vpop.permute.xlu1 %707  ;;  %772 = vmatpush.bf16.msra.mxu1 %v744_v54  ;;  %v1093_v54 = vld [vmem:[#allocation2 + $0x6] ss:$8 sm:$0xf] }
 0x137   : > { %v712_v57 = vsel %vm711_vm6, %v708_v56, %v710_v15  ;;  %v713_v58 = vsel %vm711_vm6, %v706_v14, %v708_v56  ;;  %v815_v59 = vpop.permute.xlu0 %814  ;;  %v824_v15 = vperm.slane %v822_v46, 0  ;;  %v977_v18 = vpop.permute.xlu2 %976 }
 0x138   : > { %v729_v60 = vmul.f32 %v721_v51, %v713_v58  ;;  %v730_v61 = vmul.f32 %v722_v52, %v712_v57  ;;  %v817_v62 = vsel %vm816_vm7, %v813_v42, %v815_v59  ;;  %1526 = vmatmul.msk.bf16.vlgmr.msrb.gmra.mxu2 %vm424_vm3, %v534_v30  ;;  %v465_v47 = vpop.f32.mrf.mxu1  ;;  %v993_v51 = vperm.slane %v988_v17, 3 }
 0x139   : > { %759 = vmatpush.bf16.msra.mxu0 %v741_v53  ;;  %v835_v63 = vmul.f32 %v827_v55, %v817_v62  ;;  %v990_v53 = vperm.slane %v988_v17, 0  ;;  %v1096_v55 = vperm.slane %v1093_v54, 1  ;;  %v1198_v17 = vld [vmem:[#allocation2 + $0x7] ss:$8 sm:$0xf] }
 0x13a   : > { %v733_v0 = vpack.c.bf16 %v729_v60, %v729_v60  ;;  %v734_v1 = vpack.c.bf16 %v730_v61, %v730_v61  ;;  %v452_v49 = vpop.f32.mrf.mxu0 }
 0x13b   : > { %v839_v2 = vpack.c.bf16 %v835_v63, %v835_v63 }
 0x13c   : > { %v747_v4 = vsel %vm428_vm2, %v733_v0, 0  ;;  %v750_v5 = vsel %vm428_vm2, %v734_v1, 0  ;;  %v1097_v1 = vperm.slane %v1093_v54, 2 }
 0x13d   : > { %785 = vmatpush.bf16.msra.mxu2 %v747_v4  ;;  %798 = vmatpush.bf16.msra.mxu3 %v750_v5  ;;  %v855_v8 = vsel %vm428_vm2, %v839_v2, 0  ;;  %v478_v48 = vpop.f32.mrf.mxu2  ;;  %v491_v50 = vpop.f32.mrf.mxu3 }
 0x13e   : > { %v811_v7 = vpop.permute.xlu1 %810  ;;  %v1203_v50 = vperm.slane %v1198_v17, 3 }
 0x13f   : > { %v818_v9 = vsel %vm816_vm7, %v811_v7, %v813_v42  ;;  %v979_v10 = vpop.permute.xlu0 %978 }
 0x140   : > { %v834_v12 = vmul.f32 %v826_v6, %v818_v9  ;;  %1527 = vmatmul.msk.bf16.vlgmr.msrb.gmra.mxu3 %vm424_vm3, %v534_v30  ;;  %v984_v21 = vsel %vm982_vm8, %v977_v18, %v979_v10 }
 0x141   : > { %903 = vmatpush.bf16.msrb.mxu3 %v855_v8  ;;  %1524 = vmatmul.msk.bf16.vlgmr.msrb.gmra.mxu0 %vm424_vm3, %v534_v30  ;;  %v999_v29 = vmul.f32 %v991_v19, %v984_v21  ;;  %v1201_v19 = vperm.slane %v1198_v17, 1 }
 0x142   : > { %v838_v13 = vpack.c.bf16 %v834_v12, %v834_v12  ;;  %1530 = vmatmul.msk.bf16.vlgmr.msra.gmra.mxu1 %vm424_vm3, %v1528_v11 }
 0x143   : > { %v1003_v41 = vpack.c.bf16 %v999_v29, %v999_v29 }
 0x144   : > { %v852_v14 = vsel %vm428_vm2, %v838_v13, 0  ;;  %v1098_v13 = vperm.slane %v1093_v54, 3 }
 0x145   : > { %890 = vmatpush.bf16.msrb.mxu2 %v852_v14 }
 0x146   : > { %v809_v20 = vpop.permute.xlu1 %808 }
 0x147   : > { %v819_v22 = vsel %vm816_vm7, %v809_v20, %v811_v7  ;;  %v820_v23 = vsel %vm816_vm7, %v815_v59, %v809_v20  ;;  %v1992_v24 = vpop.permute.xlu0 %1079  ;;  %v1086_v59 = vpop.permute.xlu2 %1085  ;;  %v1538_v7 = vld [vmem:[%s2177_s5 + $0x10] sm:$0xf] }
 0x148   : > { %v832_v25 = vmul.f32 %v824_v15, %v820_v23  ;;  %v833_v28 = vmul.f32 %v825_v16, %v819_v22  ;;  %1531 = vmatmul.msk.bf16.vlgmr.msra.gmra.mxu2 %vm424_vm3, %v1528_v11  ;;  %v1091_v15 = vsel %vm1087_vm9, %v1086_v59, %v1992_v24  ;;  %v1095_v16 = vperm.slane %v1093_v54, 0 }
 0x149   : > { %951 = vmatpush.bf16.msra.mxu2 %v1881_v36  ;;  %v1106_v23 = vmul.f32 %v1098_v13, %v1091_v15 }
 0x14a   : > { %v836_v30 = vpack.c.bf16 %v832_v25, %v832_v25  ;;  %v837_v31 = vpack.c.bf16 %v833_v28, %v833_v28 }
 0x14c   : > { %v846_v38 = vsel %vm428_vm2, %v836_v30, 0  ;;  %v849_v39 = vsel %vm428_vm2, %v837_v31, 0 }
 0x14d   : > { %864 = vmatpush.bf16.msrb.mxu0 %v846_v38  ;;  %877 = vmatpush.bf16.msrb.mxu1 %v849_v39 }
 0x14e   : > { %v981_v36 = vpop.permute.xlu1 %980 }
 0x14f   : > { %v983_v42 = vsel %vm982_vm8, %v979_v10, %v981_v36  ;;  %v1082_v43 = vpop.permute.xlu0 %1081 }
 0x150   : > { %v1000_v46 = vmul.f32 %v992_v40, %v983_v42  ;;  %1532 = vmatmul.msk.bf16.vlgmr.msra.gmra.mxu3 %vm424_vm3, %v1528_v11  ;;  %v1110_v42 = vpack.c.bf16 %v1106_v23, %v1106_v23 }
 0x151   : > { %938 = vmatpush.bf16.msra.mxu1 %v1875_v27  ;;  %964 = vmatpush.bf16.msra.mxu3 %v1884_v37  ;;  %v1015_v27 = vsel %vm428_vm2, %v1003_v41, 0  ;;  %v986_v37 = vsel %vm982_vm8, %v981_v36, %v1971_v3 }
 0x152   : > { %1529 = vmatmul.msk.bf16.vlgmr.msra.gmra.mxu0 %vm424_vm3, %v1528_v11  ;;  %1535 = vmatmul.msk.bf16.vlgmr.msrb.gmra.mxu1 %vm424_vm3, %v1533_v44  ;;  %v1004_v52 = vpack.c.bf16 %v1000_v46, %v1000_v46  ;;  %v1001_v60 = vmul.f32 %v993_v51, %v986_v37  ;;  %v1189_v11 = vpop.permute.xlu2 %1188  ;;  %v1303_v51 = vld [vmem:[#allocation2 + $0x20] ss:$8 sm:$0xf] }
 0x153   : > { %925 = vmatpush.bf16.msra.mxu0 %v1872_v26  ;;  %v985_v26 = vsel %vm982_vm8, %v1971_v3, %v977_v18  ;;  %v1090_v18 = vsel %vm1087_vm9, %v1992_v24, %v1082_v43  ;;  %v1306_v37 = vperm.slane %v1303_v51, 1 }
 0x154   : > { %v1018_v61 = vsel %vm428_vm2, %v1004_v52, 0  ;;  %v998_v62 = vmul.f32 %v990_v53, %v985_v26  ;;  %v1005_v0 = vpack.c.bf16 %v1001_v60, %v1001_v60  ;;  %v1103_v24 = vmul.f32 %v1095_v16, %v1090_v18  ;;  %v1553_v18 = vld [vmem:[%s2177_s5 + $0x1c] sm:$0xf] }
 0x155   : > { %1043 = vmatpush.bf16.msrb.mxu1 %v1015_v27  ;;  %v1126_v27 = vsel %vm428_vm2, %v1110_v42, 0  ;;  %v1200_v53 = vperm.slane %v1198_v17, 0 }
 0x156   : > { %v1084_v56 = vpop.permute.xlu1 %1083  ;;  %v1002_v2 = vpack.c.bf16 %v998_v62, %v998_v62  ;;  %v1021_v9 = vsel %vm428_vm2, %v1005_v0, 0  ;;  %v1307_v62 = vperm.slane %v1303_v51, 2 }
 0x157   : > { %v1089_v57 = vsel %vm1087_vm9, %v1082_v43, %v1084_v56  ;;  %v2027_v58 = vpop.permute.xlu0 %1190  ;;  %v1088_v3 = vsel %vm1087_vm9, %v1084_v56, %v1086_v59 }
 0x158   : > { %1536 = vmatmul.msk.bf16.vlgmr.msrb.gmra.mxu2 %vm424_vm3, %v1533_v44  ;;  %v1104_v63 = vmul.f32 %v1096_v55, %v1089_v57  ;;  %v1105_v8 = vmul.f32 %v1097_v1, %v1088_v3  ;;  %v1012_v10 = vsel %vm428_vm2, %v1002_v2, 0  ;;  %v1548_v2 = vld [vmem:[%s2177_s5 + $0x18] sm:$0xf] }
 0x159   : > { %1056 = vmatpush.bf16.msrb.mxu2 %v1018_v61 }
 0x15a   : > { %v1108_v4 = vpack.c.bf16 %v1104_v63, %v1104_v63  ;;  %v1109_v14 = vpack.c.bf16 %v1105_v8, %v1105_v8  ;;  %v1290_v43 = vpop.permute.xlu2 %1289 }
 0x15c   : > { %v1120_v12 = vsel %vm428_vm2, %v1108_v4, 0  ;;  %v1123_v29 = vsel %vm428_vm2, %v1109_v14, 0 }
 0x15e   : > { %v2033_v5 = vpop.permute.xlu1 %1184 }
 0x15f   : > { %v2035_v6 = vpop.permute.xlu0 %1293  ;;  %v1196_v52 = vsel %vm1192_vm10, %v2027_v58, %v2033_v5 }
 0x160   : > { %1537 = vmatmul.msk.bf16.vlgmr.msrb.gmra.mxu3 %vm424_vm3, %v1533_v44  ;;  %v1211_v56 = vmul.f32 %v1203_v50, %v1196_v52 }
 0x161   : > { %1069 = vmatpush.bf16.msrb.mxu3 %v1021_v9  ;;  %v1305_v9 = vperm.slane %v1303_v51, 0 }
 0x162   : > { %1534 = vmatmul.msk.bf16.vlgmr.msrb.gmra.mxu0 %vm424_vm3, %v1533_v44  ;;  %1540 = vmatmul.msk.bf16.vlgmr.msra.gmra.mxu1 %vm424_vm3, %v1538_v7  ;;  %v1543_v44 = vld [vmem:[%s2177_s5 + $0x14] sm:$0xf]  ;;  %v1292_v54 = vpop.permute.xlu2 %1291  ;;  %v1215_v61 = vpack.c.bf16 %v1211_v56, %v1211_v56 }
 0x163   : > { %1030 = vmatpush.bf16.msrb.mxu0 %v1012_v10  ;;  %1148 = vmatpush.bf16.msra.mxu1 %v1120_v12  ;;  %v1299_v55 = vsel %vm1297_vm11, %v1292_v54, %v2035_v6 }
 0x164   : > { %v1231_v4 = vsel %vm428_vm2, %v1215_v61, 0 }
 0x166   : > { %v1187_v20 = vpop.permute.xlu1 %1186 }
 0x167   : > { %v1194_v21 = vsel %vm1192_vm10, %v1187_v20, %v1189_v11  ;;  %v422_v22 = vpop.permute.xlu0 %421  ;;  %v1195_v26 = vsel %vm1192_vm10, %v2033_v5, %v1187_v20 }
 0x168   : > { %v464_v25 = vadd.f32 %v1996_v32, %v422_v22  ;;  %v477_v28 = vadd.f32 %v1998_v33, %v422_v22  ;;  %1541 = vmatmul.msk.bf16.vlgmr.msra.gmra.mxu2 %vm424_vm3, %v1538_v7  ;;  %v490_v30 = vadd.f32 %v2000_v34, %v422_v22  ;;  %v451_v31 = vadd.f32 %v2002_v35, %v422_v22 }
 0x169   : > { %1161 = vmatpush.bf16.msra.mxu2 %v1123_v29  ;;  %v1209_v38 = vmul.f32 %v1201_v19, %v1194_v21  ;;  %v1202_v32 = vperm.slane %v1198_v17, 2  ;;  %v1107_v33 = vpack.c.bf16 %v1103_v24, %v1103_v24  ;;  %v1193_v34 = vsel %vm1192_vm10, %v1189_v11, %v2027_v58  ;;  %v1394_v17 = vld [vmem:[%s2178_s6] sm:$0xff] }
 0x16a   : > { %v494_v39 = vmax.f32 %v464_v25, 0.0  ;;  %v495_v40 = vmax.f32 %v477_v28, 0.0  ;;  %v496_v41 = vmax.f32 %v490_v30, 0.0  ;;  %v493_v36 = vmax.f32 %v451_v31, 0.0  ;;  %1397 = vperm.xlu1 %1634, %v1394_v17   ;;  %v1558_v21 = vld [vmem:[%s2177_s5 + $0x20] sm:$0xf] }
 0x16b   : > { %v1213_v35 = vpack.c.bf16 %v1209_v38, %v1209_v38  ;;  %v1210_v46 = vmul.f32 %v1202_v32, %v1193_v34  ;;  %v1117_v47 = vsel %vm428_vm2, %v1107_v33, 0  ;;  %v1208_v59 = vmul.f32 %v1200_v53, %v1195_v26 }
 0x16c   : > { %498 = vst [vmem:[%s2064_s18 + $0x8] sm:$0xff] %v494_v39  ;;  %v1314_v58 = vmul.f32 %v1306_v37, %v1299_v55  ;;  %v1300_v11 = vsel %vm1297_vm11, %v1290_v43, %v1292_v54 }
 0x16d   : > { %499 = vst [vmem:[%s2064_s18 + $0x10] sm:$0xff] %v495_v40  ;;  %v1225_v48 = vsel %vm428_vm2, %v1213_v35, 0  ;;  %v1214_v49 = vpack.c.bf16 %v1210_v46, %v1210_v46  ;;  %v1212_v63 = vpack.c.bf16 %v1208_v59, %v1208_v59  ;;  %v1313_v14 = vmul.f32 %v1305_v9, %v1300_v11 }
 0x16e   : > { %500 = vst [vmem:[%s2064_s18 + $0x18] sm:$0xff] %v496_v41  ;;  %v1296_v60 = vpop.permute.xlu1 %1295  ;;  %v1318_v1 = vpack.c.bf16 %v1314_v58, %v1314_v58 }
 0x16f   : > { %497 = vst [vmem:[%s2064_s18] sm:$0xff] %v493_v36  ;;  %v1228_v57 = vsel %vm428_vm2, %v1214_v49, 0  ;;  %v1298_v0 = vsel %vm1297_vm11, %v2035_v6, %v1296_v60  ;;  %v1222_v5 = vsel %vm428_vm2, %v1212_v63, 0  ;;  %v1301_v10 = vsel %vm1297_vm11, %v1296_v60, %v1290_v43 }
 0x170   : > { %1542 = vmatmul.msk.bf16.vlgmr.msra.gmra.mxu3 %vm424_vm3, %v1538_v7  ;;  %v1315_v3 = vmul.f32 %v1307_v62, %v1298_v0  ;;  %v1330_v6 = vsel %vm428_vm2, %v1318_v1, 0  ;;  %v1317_v16 = vpack.c.bf16 %v1313_v14, %v1313_v14 }
 0x171   : > { %1174 = vmatpush.bf16.msra.mxu3 %v1126_v27 }
 0x172   : > { %1539 = vmatmul.msk.bf16.vlgmr.msra.gmra.mxu0 %vm424_vm3, %v1538_v7  ;;  %1545 = vmatmul.msk.bf16.vlgmr.msrb.gmra.mxu1 %vm424_vm3, %v1543_v44  ;;  %v1308_v7 = vperm.slane %v1303_v51, 3  ;;  %v1319_v8 = vpack.c.bf16 %v1315_v3, %v1315_v3  ;;  %v1327_v19 = vsel %vm428_vm2, %v1317_v16, 0 }
 0x173   : > { %1135 = vmatpush.bf16.msra.mxu0 %v1117_v47  ;;  %1253 = vmatpush.bf16.msrb.mxu1 %v1225_v48 }
 0x174   : > { %v1316_v12 = vmul.f32 %v1308_v7, %v1301_v10  ;;  %v1333_v13 = vsel %vm428_vm2, %v1319_v8, 0 }
 0x176   : > { %v1320_v15 = vpack.c.bf16 %v1316_v12, %v1316_v12 }
 0x178   : > { %1546 = vmatmul.msk.bf16.vlgmr.msrb.gmra.mxu2 %vm424_vm3, %v1543_v44  ;;  %v1336_v45 = vsel %vm428_vm2, %v1320_v15, 0 }
 0x179   : > { %1266 = vmatpush.bf16.msrb.mxu2 %v1228_v57 }
 0x180   : > { %1547 = vmatmul.msk.bf16.vlgmr.msrb.gmra.mxu3 %vm424_vm3, %v1543_v44 }
 0x181   : > { %1279 = vmatpush.bf16.msrb.mxu3 %v1231_v4 }
 0x182   : > { %1544 = vmatmul.msk.bf16.vlgmr.msrb.gmra.mxu0 %vm424_vm3, %v1543_v44  ;;  %1550 = vmatmul.msk.bf16.vlgmr.msra.gmra.mxu1 %vm424_vm3, %v1548_v2 }
 0x183   : > { %1240 = vmatpush.bf16.msrb.mxu0 %v1222_v5  ;;  %1358 = vmatpush.bf16.msra.mxu1 %v1330_v6 }
 0x188   : > { %1551 = vmatmul.msk.bf16.vlgmr.msra.gmra.mxu2 %vm424_vm3, %v1548_v2 }
 0x189   : > { %1371 = vmatpush.bf16.msra.mxu2 %v1333_v13 }
 0x190   : > { %1552 = vmatmul.msk.bf16.vlgmr.msra.gmra.mxu3 %vm424_vm3, %v1548_v2 }
 0x191   : > { %1384 = vmatpush.bf16.msra.mxu3 %v1336_v45 }
 0x192   : > { %1549 = vmatmul.msk.bf16.vlgmr.msra.gmra.mxu0 %vm424_vm3, %v1548_v2  ;;  %1555 = vmatmul.msk.bf16.vlgmr.msrb.gmra.mxu1 %vm424_vm3, %v1553_v18 }
 0x193   : > { %1345 = vmatpush.bf16.msra.mxu0 %v1327_v19 }
 0x198   : > { %1556 = vmatmul.msk.bf16.vlgmr.msrb.gmra.mxu2 %vm424_vm3, %v1553_v18 }
 0x19e   : > { %v606_v20 = vpop.f32.mrf.mxu1 }
 0x1a0   : > { %1557 = vmatmul.msk.bf16.vlgmr.msrb.gmra.mxu3 %vm424_vm3, %v1553_v18 }
 0x1a2   : > { %1554 = vmatmul.msk.bf16.vlgmr.msrb.gmra.mxu0 %vm424_vm3, %v1553_v18  ;;  %1560 = vmatmul.msk.bf16.vlgmr.msra.gmra.mxu1 %vm424_vm3, %v1558_v21 }
 0x1a6   : > { %v608_v22 = vpop.f32.mrf.mxu1 }
 0x1a8   : > { %1561 = vmatmul.msk.bf16.vlgmr.msra.gmra.mxu2 %vm424_vm3, %v1558_v21 }
 0x1ab   : > { %v619_v23 = vpop.f32.mrf.mxu2 }
 0x1ae   : > { %v593_v25 = vpop.f32.mrf.mxu0  ;;  %v673_v28 = vpop.f32.mrf.mxu1 }
 0x1af   : > { %v674_v29 = vadd.f32 %v673_v28, %v606_v20 }
 0x1b0   : > { %1562 = vmatmul.msk.bf16.vlgmr.msra.gmra.mxu3 %vm424_vm3, %v1558_v21 }
 0x1b2   : > { %1559 = vmatmul.msk.bf16.vlgmr.msra.gmra.mxu0 %vm424_vm3, %v1558_v21 }
 0x1b3   : > { %v621_v24 = vpop.f32.mrf.mxu2  ;;  %v632_v30 = vpop.f32.mrf.mxu3 }
 0x1b6   : > { %v595_v31 = vpop.f32.mrf.mxu0  ;;  %v675_v38 = vpop.f32.mrf.mxu1 }
 0x1bb   : > { %v634_v39 = vpop.f32.mrf.mxu3  ;;  %v686_v40 = vpop.f32.mrf.mxu2 }
 0x1bc   : > { %v687_v41 = vadd.f32 %v686_v40, %v619_v23 }
 0x1be   : > { %v660_v36 = vpop.f32.mrf.mxu0 }
 0x1bf   : > { %v661_v42 = vadd.f32 %v660_v36, %v593_v25  ;;  %v774_v43 = vpop.f32.mrf.mxu1 }
 0x1c0   : > { %v805_v32 = vadd.f32 %v774_v43, %v674_v29 }
 0x1c3   : > { %v688_v33 = vpop.f32.mrf.mxu2  ;;  %v699_v34 = vpop.f32.mrf.mxu3 }
 0x1c4   : > { %v700_v35 = vadd.f32 %v699_v34, %v632_v30 }
 0x1c6   : > { %v662_v44 = vpop.f32.mrf.mxu0 }
 0x1c7   : > { %v776_v46 = vpop.f32.mrf.mxu1 }
 0x1cb   : > { %v701_v27 = vpop.f32.mrf.mxu3  ;;  %v787_v47 = vpop.f32.mrf.mxu2 }
 0x1cc   : > { %v806_v48 = vadd.f32 %v787_v47, %v687_v41 }
 0x1cf   : > { %v761_v49 = vpop.f32.mrf.mxu0  ;;  %v879_v51 = vpop.f32.mrf.mxu1 }
 0x1d0   : > { %v804_v50 = vadd.f32 %v761_v49, %v661_v42  ;;  %v910_v52 = vadd.f32 %v879_v51, %v805_v32 }
 0x1d3   : > { %v789_v53 = vpop.f32.mrf.mxu2  ;;  %v800_v54 = vpop.f32.mrf.mxu3 }
 0x1d4   : > { %v807_v37 = vadd.f32 %v800_v54, %v700_v35 }
 0x1d7   : > { %v763_v26 = vpop.f32.mrf.mxu0  ;;  %v881_v55 = vpop.f32.mrf.mxu1 }
 0x1db   : > { %v802_v56 = vpop.f32.mrf.mxu3  ;;  %v892_v57 = vpop.f32.mrf.mxu2 }
 0x1dc   : > { %v911_v59 = vadd.f32 %v892_v57, %v806_v48  ;;  %v1398_v36 = vpop.permute.xlu1 %1397 }
 0x1df   : > { %v866_v58 = vpop.f32.mrf.mxu0  ;;  %v940_v61 = vpop.f32.mrf.mxu1 }
 0x1e0   : > { %v909_v60 = vadd.f32 %v866_v58, %v804_v50  ;;  %v971_v29 = vadd.f32 %v940_v61, %v910_v52 }
 0x1e3   : > { %v894_v62 = vpop.f32.mrf.mxu2  ;;  %v905_v63 = vpop.f32.mrf.mxu3 }
 0x1e4   : > { %v912_v0 = vadd.f32 %v905_v63, %v807_v37 }
 0x1e7   : > { %v868_v1 = vpop.f32.mrf.mxu0  ;;  %v942_v2 = vpop.f32.mrf.mxu1 }
 0x1eb   : > { %v907_v3 = vpop.f32.mrf.mxu3  ;;  %v953_v4 = vpop.f32.mrf.mxu2 }
 0x1ec   : > { %v972_v34 = vadd.f32 %v953_v4, %v911_v59 }
 0x1ef   : > { %v927_v5 = vpop.f32.mrf.mxu0  ;;  %v1045_v6 = vpop.f32.mrf.mxu1 }
 0x1f0   : > { %v1076_v24 = vadd.f32 %v1045_v6, %v971_v29  ;;  %v970_v27 = vadd.f32 %v927_v5, %v909_v60 }
 0x1f3   : > { %v955_v7 = vpop.f32.mrf.mxu2  ;;  %v966_v8 = vpop.f32.mrf.mxu3 }
 0x1f4   : > { %v973_v54 = vadd.f32 %v966_v8, %v912_v0 }
 0x1f7   : > { %v929_v9 = vpop.f32.mrf.mxu0  ;;  %v1047_v10 = vpop.f32.mrf.mxu1 }
 0x1fb   : > { %v968_v11 = vpop.f32.mrf.mxu3  ;;  %v1058_v12 = vpop.f32.mrf.mxu2 }
 0x1fc   : > { %v1077_v44 = vadd.f32 %v1058_v12, %v972_v34 }
 0x1ff   : > { %v1032_v13 = vpop.f32.mrf.mxu0  ;;  %v1150_v14 = vpop.f32.mrf.mxu1 }
 0x200   : > { %v1181_v38 = vadd.f32 %v1150_v14, %v1076_v24  ;;  %v1075_v49 = vadd.f32 %v1032_v13, %v970_v27 }
 0x203   : > { %v1060_v15 = vpop.f32.mrf.mxu2  ;;  %v1071_v16 = vpop.f32.mrf.mxu3 }
 0x204   : > { %v1078_v55 = vadd.f32 %v1071_v16, %v973_v54 }
 0x207   : > { %v1034_v17 = vpop.f32.mrf.mxu0  ;;  %v1152_v18 = vpop.f32.mrf.mxu1 }
 0x20b   : > { %v1073_v45 = vpop.f32.mrf.mxu3  ;;  %v1163_v19 = vpop.f32.mrf.mxu2 }
 0x20c   : > { %v1182_v48 = vadd.f32 %v1163_v19, %v1077_v44 }
 0x20f   : > { %v1137_v20 = vpop.f32.mrf.mxu0  ;;  %v1255_v21 = vpop.f32.mrf.mxu1 }
 0x210   : > { %v1286_v39 = vadd.f32 %v1255_v21, %v1181_v38  ;;  %v1180_v51 = vadd.f32 %v1137_v20, %v1075_v49 }
 0x213   : > { %v1165_v22 = vpop.f32.mrf.mxu2  ;;  %v1176_v23 = vpop.f32.mrf.mxu3 }
 0x214   : > { %v1183_v58 = vadd.f32 %v1176_v23, %v1078_v55 }
 0x217   : > { %v1139_v25 = vpop.f32.mrf.mxu0  ;;  %v1257_v28 = vpop.f32.mrf.mxu1 }
 0x21b   : > { %v1178_v30 = vpop.f32.mrf.mxu3  ;;  %v1268_v31 = vpop.f32.mrf.mxu2 }
 0x21c   : > { %v1287_v50 = vadd.f32 %v1268_v31, %v1182_v48 }
 0x21f   : > { %v1242_v40 = vpop.f32.mrf.mxu0  ;;  %v1360_v41 = vpop.f32.mrf.mxu1 }
 0x220   : > { %v1391_v42 = vadd.f32 %v1360_v41, %v1286_v39  ;;  %v1285_v26 = vadd.f32 %v1242_v40, %v1180_v51 }
 0x222   : > { %v1401_v43 = vadd.f32 %v1398_v36, %v1391_v42 }
 0x223   : > { %v1270_v32 = vpop.f32.mrf.mxu2  ;;  %v1281_v33 = vpop.f32.mrf.mxu3 }
 0x224   : > { %v1405_v35 = vmax.f32 %v1401_v43, 0.0  ;;  %v1288_v62 = vadd.f32 %v1281_v33, %v1183_v58 }
 0x226   : > { %1409 = vst [vmem:[%s2064_s18 + $0x28] sm:$0xff] %v1405_v35 }
 0x227   : > { %v1244_v46 = vpop.f32.mrf.mxu0  ;;  %v1362_v47 = vpop.f32.mrf.mxu1 }
 0x22b   : > { %v1283_v52 = vpop.f32.mrf.mxu3  ;;  %v1373_v53 = vpop.f32.mrf.mxu2 }
 0x22c   : > { %v1392_v37 = vadd.f32 %v1373_v53, %v1287_v50 }
 0x22e   : > { %v1402_v56 = vadd.f32 %v1398_v36, %v1392_v37 }
 0x22f   : > { %v1347_v57 = vpop.f32.mrf.mxu0 }
 0x230   : > { %v1390_v59 = vadd.f32 %v1347_v57, %v1285_v26  ;;  %v1406_v60 = vmax.f32 %v1402_v56, 0.0 }
 0x232   : > { %v1400_v61 = vadd.f32 %v1398_v36, %v1390_v59  ;;  %1410 = vst [vmem:[%s2064_s18 + $0x30] sm:$0xff] %v1406_v60 }
 0x233   : > { %v1386_v0 = vpop.f32.mrf.mxu3  ;;  %v1375_v1 = vpop.f32.mrf.mxu2 }
 0x234   : > { %v1404_v63 = vmax.f32 %v1400_v61, 0.0  ;;  %v1393_v2 = vadd.f32 %v1386_v0, %v1288_v62 }
 0x236   : > { %1408 = vst [vmem:[%s2064_s18 + $0x20] sm:$0xff] %v1404_v63  ;;  %v1403_v3 = vadd.f32 %v1398_v36, %v1393_v2 }
 0x237   : > { %v1349_v4 = vpop.f32.mrf.mxu0 }
 0x238   : > { %v1407_v5 = vmax.f32 %v1403_v3, 0.0 }
 0x23a   : > { %1411 = vst [vmem:[%s2064_s18 + $0x38] sm:$0xff] %v1407_v5 }
 0x23b   : > { %v1388_v6 = vpop.f32.mrf.mxu3 }
 0x23c   : > { %1692 = shalt.err (!%p1689_p8)
}
 0x23d   : > { %s1745_s13 = smov 512   ;;  %s1746_s18 = smov 1024  }
 0x23e   : > { %s1747_s20 = smov 32  }
 0x23f   : > { %1573 = dma.vmem_to_hbm [thread:$0]  (%p1831_p5), %s1426_s22, 1024, %s1428_s23, %s1413_s9, %s1745_s13, %s1746_s18, %s1747_s20  }
 0x240 PF: > { %p1585_p9 = scmp.ge.s32.totalorder %s1731_s30, 2  ;;  %s1442_s21 = sand.u32 1, %s1719_s27  }
 0x241   : > { %s1443_s24 = scalar_lea.sflag [#allocation4], %s1442_s21 }
 0x242   : > { %p1580_p10 = pnand %p1585_p9, %p1835_p6 }
 0x244   : > { %p1581_p11 = pneg %p1580_p10 }
 0x246   : > { %1714 = dma.done.wait (%p1581_p11), %s1443_s24, 1024  }
 0x247   : > { %1716 = vsyncadd (%p1581_p11), %s1443_s24, 4294966272  ;;  %p19_p12 = scmp.ge.s32.totalorder %s1818_s11, 4   ;;  %s2183_s27 = smov %s1723_s28 }
 0x248   : > { %s2184_s28 = smov %s1727_s29  ;;  %s2185_s29 = smov %s1829_s14 }
 0x249   : > { %s2186_s30 = smov %s1818_s11  ;;  %21 = sbr.rel (!%p19_p12) target bundleno = 4 (0x4), region = 107 }
 0x24e   :  { %1449 = vsyncpa [#allocation3], 1 }
 0x24f   :  { %1451 = vsyncpa [#allocation3 + $0x1], 1 }
 0x250   :  { %1452 = vsyncpa [#allocation4], 1 }
 0x251   :  { %1454 = vsyncpa [#allocation4 + $0x1], 1 }

</bundles_post_ra>
